<compile_context>
chip_gen: v6e
topology: v6e:2x2x1
jax: 0.10.0
libtpu: 0.0.40
codegen_flags: <defaults>
</compile_context>

<pallas_src>
import functools

import jax
import jax.numpy as jnp
from jax.experimental import pallas as pl
from jax.experimental.pallas import tpu as pltpu


# ---------------------------------------------------------------------------
# Kernel
# ---------------------------------------------------------------------------

def _router_kernel(x_ref, w1_ref, w2m_ref, w2h_ref, neurons_ref, heads_ref,
                   *, mlp_dim_p):
    """One batch tile of the router forward.

    fc1 is one fused MXU push; the mlp/mha split point (mlp_dim_p) is a
    multiple of 128 (weights zero-padded at prep time), so the slice of the
    fp32 result stays on a vreg lane-tile boundary.
    """
    x = x_ref[...]
    out = jnp.dot(x, w1_ref[...], preferred_element_type=jnp.float32)
    # TODO(synk): layer_norm1 / ReLU in the PyTorch forward are dead code
    # (their results are overwritten before use), so they are not computed.
    mlp_out = out[:, :mlp_dim_p].astype(w2m_ref.dtype)
    mha_out = out[:, mlp_dim_p:].astype(w2h_ref.dtype)
    neurons_ref[...] = jnp.dot(
        mlp_out, w2m_ref[...], preferred_element_type=jnp.float32
    ).astype(neurons_ref.dtype)
    heads_ref[...] = jnp.dot(
        mha_out, w2h_ref[...], preferred_element_type=jnp.float32
    ).astype(heads_ref.dtype)


# ---------------------------------------------------------------------------
# Weight preparation (do ONCE, cache, reuse across forward calls)
# ---------------------------------------------------------------------------

def _round_up(x, m):
    return ((x + m - 1) // m) * m


def prepare_router_weights(w_fc1, w_fc2_mlp, w_fc2_mha, mlp_dim, mha_dim):
    """Transpose to [in, out] and zero-pad mlp/mha/heads dims to multiples of
    128 so every matmul operand and the fc1 split point are lane-aligned.

    PyTorch Linear weight layout expected:
      w_fc1     : [mlp_dim + mha_dim, embed_dim]
      w_fc2_mlp : [total_neurons, mlp_dim]
      w_fc2_mha : [num_heads, mha_dim]

    Zero padding contributes nothing numerically (padded fc1 columns are
    zero AND the matching fc2 rows are zero); it is a one-time prep cost.
    """
    out1, embed_dim = w_fc1.shape
    if out1 != mlp_dim + mha_dim:
        raise ValueError(
            f"w_fc1 has {out1} output features, expected {mlp_dim + mha_dim}")
    total_neurons, mlp_in = w_fc2_mlp.shape
    if mlp_in != mlp_dim:
        raise ValueError(f"w_fc2_mlp in_features {mlp_in} != mlp_dim {mlp_dim}")
    num_heads, mha_in = w_fc2_mha.shape
    if mha_in != mha_dim:
        raise ValueError(f"w_fc2_mha in_features {mha_in} != mha_dim {mha_dim}")

    mlp_p = _round_up(mlp_dim, 128)
    mha_p = _round_up(mha_dim, 128)
    heads_p = _round_up(num_heads, 128)

    w1t = jnp.asarray(w_fc1).T                         # [E, mlp_dim + mha_dim]
    w1 = jnp.zeros((embed_dim, mlp_p + mha_p), dtype=w_fc1.dtype)
    w1 = w1.at[:, :mlp_dim].set(w1t[:, :mlp_dim])
    w1 = w1.at[:, mlp_p:mlp_p + mha_dim].set(w1t[:, mlp_dim:])

    w2m = jnp.zeros((mlp_p, total_neurons), dtype=w_fc2_mlp.dtype)
    w2m = w2m.at[:mlp_dim, :].set(jnp.asarray(w_fc2_mlp).T)

    w2h = jnp.zeros((mha_p, heads_p), dtype=w_fc2_mha.dtype)
    w2h = w2h.at[:mha_dim, :num_heads].set(jnp.asarray(w_fc2_mha).T)

    return dict(
        embed_dim=embed_dim, mlp_dim=mlp_dim, mha_dim=mha_dim,
        mlp_dim_p=mlp_p, mha_dim_p=mha_p,
        total_neurons=total_neurons, num_heads=num_heads, heads_pad=heads_p,
        w1=w1, w2m=w2m, w2h=w2h,
    )


# ---------------------------------------------------------------------------
# Helpers
# ---------------------------------------------------------------------------

def _vmem_capacity_bytes():
    """Generation-aware physical VMEM capacity; None if unavailable."""
    try:
        info = pltpu.get_tpu_info()
        cap = getattr(info, "vmem_capacity_bytes", None)
        if cap:
            return int(cap)
    except Exception:
        pass
    return None


def _weight_spec(block_shape, single_buffer):
    """Constant-index BlockSpec for a resident weight.

    Requests single buffering (the index map never changes, so a second
    buffer is pure VMEM waste).  Returns (spec, effective_buffer_count) so the
    VMEM estimate matches what was actually requested.
    """
    index_map = lambda i: (0, 0)
    if single_buffer and hasattr(pl, "Buffered"):
        try:
            return pl.BlockSpec(block_shape, index_map,
                                pipeline_mode=pl.Buffered(1)), 1
        except (TypeError, ValueError):
            pass
    return pl.BlockSpec(block_shape, index_map), 2


def _choose_tb(batch, tb_max, min_steps=4):
    """Pick the batch tile: a multiple of 16 (fallback 8) that divides
    `batch`, is <= tb_max, and leaves >= min_steps grid steps when possible
    (so the DMA pipeline actually overlaps)."""
    tb_max = max(8, min(tb_max, batch))
    pref_cap = max(8, batch // min_steps) if batch >= 8 * min_steps else tb_max
    for align in (16, 8):
        for cap in (min(tb_max, pref_cap), tb_max):
            cand = (cap // align) * align
            while cand >= align:
                if batch % cand == 0:
                    return cand
                cand -= align
    return batch   # awkward batch -> single step -> wrapper uses XLA fallback


def _xla_forward(x, weights):
    """Plain XLA path for tiny batches (a one-step Pallas launch just exposes
    the prologue/epilogue DMA)."""
    dtype = x.dtype
    mlp_p = weights["mlp_dim_p"]
    out = jnp.dot(x, weights["w1"], preferred_element_type=jnp.float32)
    mlp = out[:, :mlp_p].astype(dtype)
    mha = out[:, mlp_p:].astype(dtype)
    neurons = jnp.dot(mlp, weights["w2m"],
                      preferred_element_type=jnp.float32).astype(dtype)
    heads = jnp.dot(mha, weights["w2h"],
                    preferred_element_type=jnp.float32).astype(dtype)
    return neurons, heads


# ---------------------------------------------------------------------------
# Pallas forward
# ---------------------------------------------------------------------------

def _pallas_forward(x, weights, tb, grid_steps):
    B, E = x.shape
    dtype = x.dtype
    mlp_p = weights["mlp_dim_p"]
    mha_p = weights["mha_dim_p"]
    total_neurons = weights["total_neurons"]
    heads_pad = weights["heads_pad"]
    w1, w2m, w2h = weights["w1"], weights["w2m"], weights["w2h"]

    kernel = functools.partial(_router_kernel, mlp_dim_p=mlp_p)
    itemsize = int(jnp.dtype(dtype).itemsize)
    weight_elems = int(w1.size) + int(w2m.size) + int(w2h.size)

    # Advisory cost hint so XLA can schedule neighbouring ops around this call.
    cost = pl.CostEstimate(
        flops=int(2 * B * (E * (mlp_p + mha_p)
                           + mlp_p * total_neurons + mha_p * heads_pad)),
        transcendentals=0,
        bytes_accessed=int(itemsize * (B * (E + total_neurons + heads_pad)
                                       + weight_elems)),
    )

    def build(single_buffer_weights):
        w_specs, w_buf = [], 1
        for shape in ((E, mlp_p + mha_p),
                      (mlp_p, total_neurons),
                      (mha_p, heads_pad)):
            spec, nbuf = _weight_spec(shape, single_buffer_weights)
            w_specs.append(spec)
            w_buf = max(w_buf, nbuf)

        in_specs = [pl.BlockSpec((tb, E), lambda i: (i, 0))] + w_specs
        out_specs = [pl.BlockSpec((tb, total_neurons), lambda i: (i, 0)),
                     pl.BlockSpec((tb, heads_pad), lambda i: (i, 0))]

        # VMEM budget using the ACTUAL buffer counts:
        #   streamed x + outputs: default 2-deep double buffering
        #   resident weights:     w_buf copies (1 when single-buffered)
        #   fp32 fc1/fc2 intermediates for the live tile
        stream_bytes = 2 * tb * (E + total_neurons + heads_pad) * itemsize
        weight_bytes = w_buf * weight_elems * itemsize
        f32_bytes = 4 * tb * (mlp_p + mha_p + total_neurons + heads_pad)
        vmem_est = stream_bytes + weight_bytes + f32_bytes + (2 << 20)

        cap_hw = _vmem_capacity_bytes()
        # Leave >=16 MiB of physical VMEM for compiler scratch (v7x: 64 MiB
        # physical -> 48 MiB cap; v5e/v6e: 128 MiB -> 112 MiB cap).  Without
        # hardware info, stay under the smallest generation's budget.
        cap = max(cap_hw - (16 << 20), 32 << 20) if cap_hw else (48 << 20)
        vmem_limit = int(min(max(32 << 20, vmem_est + vmem_est // 2), cap))

        return pl.pallas_call(
            kernel,
            out_shape=(jax.ShapeDtypeStruct((B, total_neurons), dtype),
                       jax.ShapeDtypeStruct((B, heads_pad), dtype)),
            grid_spec=pltpu.PrefetchScalarGridSpec(
                num_scalar_prefetch=0,
                grid=(grid_steps,),
                in_specs=in_specs,
                out_specs=out_specs,
            ),
            compiler_params=pltpu.CompilerParams(
                # TODO(synk): on v7x use pltpu.CORE_PARALLEL here (2 TCs) and
                # N-tile total_neurons when w2m outgrows the 64 MiB VMEM.
                dimension_semantics=("parallel",),
                vmem_limit_bytes=vmem_limit,
            ),
            cost_estimate=cost,
        )

    try:
        return build(True)(x, w1, w2m, w2h)
    except Exception:
        # Fallback if single-buffered (Buffered(1)) weight specs are not
        # supported by this JAX build: default double buffering (correct,
        # just uses more VMEM).
        return build(False)(x, w1, w2m, w2h)


# ---------------------------------------------------------------------------
# Forward wrapper
# ---------------------------------------------------------------------------

def hybrid_fused_router_forward(x, weights, *, tb=512, min_grid_steps=4,
                                return_padded_heads=False,
                                allow_xla_fallback=True):
    """x: [B, embed_dim]; weights: output of prepare_router_weights (cached).

    Returns (neurons [B, 4*embed_dim], heads [B, num_heads]).  With
    return_padded_heads=True, heads is returned zero-padded to a multiple of
    128 lanes (skips a second HBM pass for consumers that only read the first
    num_heads columns, e.g. top-k head selection).
    """
    B, E = x.shape
    if E != weights["embed_dim"]:
        raise ValueError(f"x feature dim {E} != embed_dim {weights['embed_dim']}")

    tb = _choose_tb(B, tb, min_grid_steps)
    grid_steps = B // tb

    if allow_xla_fallback and grid_steps < 2:
        neurons, heads_padded = _xla_forward(x, weights)
    else:
        neurons, heads_padded = _pallas_forward(x, weights, tb, grid_steps)

    if return_padded_heads:
        return neurons, heads_padded
    return neurons, heads_padded[:, :weights["num_heads"]]


# ---------------------------------------------------------------------------
# Reference + demo
# ---------------------------------------------------------------------------

def _reference_forward(x, w_fc1, w_fc2_mlp, w_fc2_mha, mlp_dim, dtype):
    out = jnp.dot(x, w_fc1.T, preferred_element_type=jnp.float32)
    mlp = out[:, :mlp_dim].astype(dtype)
    mha = out[:, mlp_dim:].astype(dtype)
    neurons = jnp.dot(mlp, w_fc2_mlp.T,
                      preferred_element_type=jnp.float32).astype(dtype)
    heads = jnp.dot(mha, w_fc2_mha.T,
                    preferred_element_type=jnp.float32).astype(dtype)
    return neurons, heads


def _run_case(key, *, embed_dim, num_heads, mlp_dim, mha_dim, batch, dtype):
    total_neurons = embed_dim * 4
    kx, k1, k2, k3 = jax.random.split(key, 4)
    x = jax.random.normal(kx, (batch, embed_dim), jnp.float32).astype(dtype)
    # PyTorch Linear weight layout: [out_features, in_features]
    w_fc1 = (jax.random.normal(k1, (mlp_dim + mha_dim, embed_dim),
                               jnp.float32) * 0.05).astype(dtype)
    w_fc2_mlp = (jax.random.normal(k2, (total_neurons, mlp_dim),
                                   jnp.float32) * 0.05).astype(dtype)
    w_fc2_mha = (jax.random.normal(k3, (num_heads, mha_dim),
                                   jnp.float32) * 0.05).astype(dtype)

    # Pre-transpose / pre-pad once (cache across forward calls).
    weights = prepare_router_weights(w_fc1, w_fc2_mlp, w_fc2_mha,
                                     mlp_dim, mha_dim)
    neurons, heads = hybrid_fused_router_forward(x, weights)
    jax.block_until_ready((neurons, heads))

    neurons_ref, heads_ref = _reference_forward(
        x, w_fc1, w_fc2_mlp, w_fc2_mha, mlp_dim, dtype)

    assert neurons.shape == (batch, total_neurons)
    assert heads.shape == (batch, num_heads)
    assert jnp.allclose(neurons.astype(jnp.float32),
                        neurons_ref.astype(jnp.float32),
                        atol=2e-2, rtol=2e-2), "neurons mismatch"
    assert jnp.allclose(heads.astype(jnp.float32),
                        heads_ref.astype(jnp.float32),
                        atol=2e-2, rtol=2e-2), "heads mismatch"


if __name__ == "__main__":
    dtype = jnp.bfloat16
    key = jax.random.PRNGKey(0)
    k_a, k_b, k_c = jax.random.split(key, 3)

    # Case 1: already 128-aligned mlp/mha dims; tb=64 -> grid=(4,) so the
    # pipeline has 4 steps (DMA overlaps compute).
    _run_case(k_a, embed_dim=32, num_heads=8, mlp_dim=128, mha_dim=128,
              batch=256, dtype=dtype)

    # Case 2: non-128-aligned mlp/mha dims; zero-padded to 128 at weight-prep
    # time so the SAME fused kernel is used (no split fallback). grid=(4,).
    _run_case(k_b, embed_dim=32, num_heads=8, mlp_dim=96, mha_dim=48,
              batch=128, dtype=dtype)

    # Case 3: tiny batch -> a Pallas launch would be a single exposed step,
    # so the wrapper branches to plain XLA dots.
    _run_case(k_c, embed_dim=32, num_heads=8, mlp_dim=128, mha_dim=128,
              batch=4, dtype=dtype)

    print("KERNEL_OK")
</pallas_src>

<mosaic_0001>
module attributes {stable_mosaic.version = 11 : i64} {
  func.func @_router_kernel(%arg0: i32, %arg1: memref<64x32xbf16, #tpu.memory_space<vmem>>, %arg2: memref<32x256xbf16, #tpu.memory_space<vmem>>, %arg3: memref<128x128xbf16, #tpu.memory_space<vmem>>, %arg4: memref<128x128xbf16, #tpu.memory_space<vmem>>, %arg5: memref<64x128xbf16, #tpu.memory_space<vmem>>, %arg6: memref<64x128xbf16, #tpu.memory_space<vmem>>) attributes {dimension_semantics = [#tpu.dimension_semantics<parallel>], iteration_bounds = array<i64: 4>, scalar_prefetch = 0 : i64, scratch_operands = 0 : i64, tpu.core_type = #tpu.core_type<tc>, window_params = [{transform_indices = @transform_0, window_bounds = array<i64: 64, 32>}, {pipeline_mode = #tpu.pipeline_mode<synchronous>, transform_indices = @transform_1, window_bounds = array<i64: 32, 256>}, {pipeline_mode = #tpu.pipeline_mode<synchronous>, transform_indices = @transform_2, window_bounds = array<i64: 128, 128>}, {pipeline_mode = #tpu.pipeline_mode<synchronous>, transform_indices = @transform_3, window_bounds = array<i64: 128, 128>}, {transform_indices = @transform_4, window_bounds = array<i64: 64, 128>}, {transform_indices = @transform_5, window_bounds = array<i64: 64, 128>}]} {
    %c0 = arith.constant 0 : index
    %c0_0 = arith.constant 0 : index
    %0 = vector.load %arg1[%c0, %c0_0] : memref<64x32xbf16, #tpu.memory_space<vmem>>, vector<64x32xbf16>
    %c0_1 = arith.constant 0 : index
    %c0_2 = arith.constant 0 : index
    %1 = vector.load %arg2[%c0_1, %c0_2] : memref<32x256xbf16, #tpu.memory_space<vmem>>, vector<32x256xbf16>
    %cst = arith.constant dense<0.000000e+00> : vector<64x256xf32>
    %2 = tpu.matmul %0, %1, %cst {dimension_numbers = #tpu.dot_dimension_numbers<[1], [0], [0], [1], [0, 0, 1, 1], [], []>} : vector<64x32xbf16>, vector<32x256xbf16>, vector<64x256xf32> -> vector<64x256xf32>
    %3 = vector.extract_strided_slice %2 {offsets = [0, 0], sizes = [64, 128], strides = [1, 1]} : vector<64x256xf32> to vector<64x128xf32>
    %4 = arith.truncf %3 : vector<64x128xf32> to vector<64x128xbf16>
    %5 = vector.extract_strided_slice %2 {offsets = [0, 128], sizes = [64, 128], strides = [1, 1]} : vector<64x256xf32> to vector<64x128xf32>
    %6 = arith.truncf %5 : vector<64x128xf32> to vector<64x128xbf16>
    %c0_3 = arith.constant 0 : index
    %c0_4 = arith.constant 0 : index
    %7 = vector.load %arg3[%c0_3, %c0_4] : memref<128x128xbf16, #tpu.memory_space<vmem>>, vector<128x128xbf16>
    %cst_5 = arith.constant dense<0.000000e+00> : vector<64x128xf32>
    %8 = tpu.matmul %4, %7, %cst_5 {dimension_numbers = #tpu.dot_dimension_numbers<[1], [0], [0], [1], [0, 0, 1, 1], [], []>} : vector<64x128xbf16>, vector<128x128xbf16>, vector<64x128xf32> -> vector<64x128xf32>
    %9 = arith.truncf %8 : vector<64x128xf32> to vector<64x128xbf16>
    %c0_6 = arith.constant 0 : index
    %c0_7 = arith.constant 0 : index
    %10 = vector.load %arg5[%c0_6, %c0_7] : memref<64x128xbf16, #tpu.memory_space<vmem>>, vector<64x128xbf16>
    tpu.vector_store %arg5[%c0_6, %c0_7], %9 {strides = array<i32>} : memref<64x128xbf16, #tpu.memory_space<vmem>>, vector<64x128xbf16>,
    %c0_8 = arith.constant 0 : index
    %c0_9 = arith.constant 0 : index
    %11 = vector.load %arg4[%c0_8, %c0_9] : memref<128x128xbf16, #tpu.memory_space<vmem>>, vector<128x128xbf16>
    %cst_10 = arith.constant dense<0.000000e+00> : vector<64x128xf32>
    %12 = tpu.matmul %6, %11, %cst_10 {dimension_numbers = #tpu.dot_dimension_numbers<[1], [0], [0], [1], [0, 0, 1, 1], [], []>} : vector<64x128xbf16>, vector<128x128xbf16>, vector<64x128xf32> -> vector<64x128xf32>
    %13 = arith.truncf %12 : vector<64x128xf32> to vector<64x128xbf16>
    %c0_11 = arith.constant 0 : index
    %c0_12 = arith.constant 0 : index
    %14 = vector.load %arg6[%c0_11, %c0_12] : memref<64x128xbf16, #tpu.memory_space<vmem>>, vector<64x128xbf16>
    tpu.vector_store %arg6[%c0_11, %c0_12], %13 {strides = array<i32>} : memref<64x128xbf16, #tpu.memory_space<vmem>>, vector<64x128xbf16>,
    return
  }
  func.func @transform_0(%arg0: i32) -> (i32, i32) {
    %c0_i32 = arith.constant 0 : i32
    %c0_i32_0 = arith.constant 0 : i32
    return %arg0, %c0_i32 : i32, i32
  }
  func.func @transform_1(%arg0: i32) -> (i32, i32) {
    %c0_i32 = arith.constant 0 : i32
    %c0_i32_0 = arith.constant 0 : i32
    %c0_i32_1 = arith.constant 0 : i32
    return %c0_i32, %c0_i32_0 : i32, i32
  }
  func.func @transform_2(%arg0: i32) -> (i32, i32) {
    %c0_i32 = arith.constant 0 : i32
    %c0_i32_0 = arith.constant 0 : i32
    %c0_i32_1 = arith.constant 0 : i32
    return %c0_i32, %c0_i32_0 : i32, i32
  }
  func.func @transform_3(%arg0: i32) -> (i32, i32) {
    %c0_i32 = arith.constant 0 : i32
    %c0_i32_0 = arith.constant 0 : i32
    %c0_i32_1 = arith.constant 0 : i32
    return %c0_i32, %c0_i32_0 : i32, i32
  }
  func.func @transform_4(%arg0: i32) -> (i32, i32) {
    %c0_i32 = arith.constant 0 : i32
    %c0_i32_0 = arith.constant 0 : i32
    return %arg0, %c0_i32 : i32, i32
  }
  func.func @transform_5(%arg0: i32) -> (i32, i32) {
    %c0_i32 = arith.constant 0 : i32
    %c0_i32_0 = arith.constant 0 : i32
    return %arg0, %c0_i32 : i32, i32
  }
}

module attributes {stable_mosaic.version = 11 : i64} {
  func.func @_router_kernel(%arg0: i32, %arg1: memref<64x32xbf16, #tpu.memory_space<vmem>>, %arg2: memref<32x256xbf16, #tpu.memory_space<vmem>>, %arg3: memref<128x128xbf16, #tpu.memory_space<vmem>>, %arg4: memref<128x128xbf16, #tpu.memory_space<vmem>>, %arg5: memref<64x128xbf16, #tpu.memory_space<vmem>>, %arg6: memref<64x128xbf16, #tpu.memory_space<vmem>>) attributes {dimension_semantics = [#tpu.dimension_semantics<parallel>], iteration_bounds = array<i64: 4>, scalar_prefetch = 0 : i64, scratch_operands = 0 : i64, tpu.core_type = #tpu.core_type<tc>, window_params = [{transform_indices = @transform_0, window_bounds = array<i64: 64, 32>}, {pipeline_mode = #tpu.pipeline_mode<synchronous>, transform_indices = @transform_1, window_bounds = array<i64: 32, 256>}, {pipeline_mode = #tpu.pipeline_mode<synchronous>, transform_indices = @transform_2, window_bounds = array<i64: 128, 128>}, {pipeline_mode = #tpu.pipeline_mode<synchronous>, transform_indices = @transform_3, window_bounds = array<i64: 128, 128>}, {transform_indices = @transform_4, window_bounds = array<i64: 64, 128>}, {transform_indices = @transform_5, window_bounds = array<i64: 64, 128>}]} {
    %c0 = arith.constant 0 : index
    %c0_0 = arith.constant 0 : index
    %0 = vector.load %arg1[%c0, %c0_0] : memref<64x32xbf16, #tpu.memory_space<vmem>>, vector<64x32xbf16>
    %c0_1 = arith.constant 0 : index
    %c0_2 = arith.constant 0 : index
    %1 = vector.load %arg2[%c0_1, %c0_2] : memref<32x256xbf16, #tpu.memory_space<vmem>>, vector<32x256xbf16>
    %cst = arith.constant dense<0.000000e+00> : vector<64x256xf32>
    %2 = tpu.matmul %0, %1, %cst {dimension_numbers = #tpu.dot_dimension_numbers<[1], [0], [0], [1], [0, 0, 1, 1], [], []>} : vector<64x32xbf16>, vector<32x256xbf16>, vector<64x256xf32> -> vector<64x256xf32>
    %3 = vector.extract_strided_slice %2 {offsets = [0, 0], sizes = [64, 128], strides = [1, 1]} : vector<64x256xf32> to vector<64x128xf32>
    %4 = arith.truncf %3 : vector<64x128xf32> to vector<64x128xbf16>
    %5 = vector.extract_strided_slice %2 {offsets = [0, 128], sizes = [64, 128], strides = [1, 1]} : vector<64x256xf32> to vector<64x128xf32>
    %6 = arith.truncf %5 : vector<64x128xf32> to vector<64x128xbf16>
    %c0_3 = arith.constant 0 : index
    %c0_4 = arith.constant 0 : index
    %7 = vector.load %arg3[%c0_3, %c0_4] : memref<128x128xbf16, #tpu.memory_space<vmem>>, vector<128x128xbf16>
    %cst_5 = arith.constant dense<0.000000e+00> : vector<64x128xf32>
    %8 = tpu.matmul %4, %7, %cst_5 {dimension_numbers = #tpu.dot_dimension_numbers<[1], [0], [0], [1], [0, 0, 1, 1], [], []>} : vector<64x128xbf16>, vector<128x128xbf16>, vector<64x128xf32> -> vector<64x128xf32>
    %9 = arith.truncf %8 : vector<64x128xf32> to vector<64x128xbf16>
    %c0_6 = arith.constant 0 : index
    %c0_7 = arith.constant 0 : index
    %10 = vector.load %arg5[%c0_6, %c0_7] : memref<64x128xbf16, #tpu.memory_space<vmem>>, vector<64x128xbf16>
    tpu.vector_store %arg5[%c0_6, %c0_7], %9 {strides = array<i32>} : memref<64x128xbf16, #tpu.memory_space<vmem>>, vector<64x128xbf16>,
    %c0_8 = arith.constant 0 : index
    %c0_9 = arith.constant 0 : index
    %11 = vector.load %arg4[%c0_8, %c0_9] : memref<128x128xbf16, #tpu.memory_space<vmem>>, vector<128x128xbf16>
    %cst_10 = arith.constant dense<0.000000e+00> : vector<64x128xf32>
    %12 = tpu.matmul %6, %11, %cst_10 {dimension_numbers = #tpu.dot_dimension_numbers<[1], [0], [0], [1], [0, 0, 1, 1], [], []>} : vector<64x128xbf16>, vector<128x128xbf16>, vector<64x128xf32> -> vector<64x128xf32>
    %13 = arith.truncf %12 : vector<64x128xf32> to vector<64x128xbf16>
    %c0_11 = arith.constant 0 : index
    %c0_12 = arith.constant 0 : index
    %14 = vector.load %arg6[%c0_11, %c0_12] : memref<64x128xbf16, #tpu.memory_space<vmem>>, vector<64x128xbf16>
    tpu.vector_store %arg6[%c0_11, %c0_12], %13 {strides = array<i32>} : memref<64x128xbf16, #tpu.memory_space<vmem>>, vector<64x128xbf16>,
    return
  }
  func.func @transform_0(%arg0: i32) -> (i32, i32) {
    %c0_i32 = arith.constant 0 : i32
    %c0_i32_0 = arith.constant 0 : i32
    return %arg0, %c0_i32 : i32, i32
  }
  func.func @transform_1(%arg0: i32) -> (i32, i32) {
    %c0_i32 = arith.constant 0 : i32
    %c0_i32_0 = arith.constant 0 : i32
    %c0_i32_1 = arith.constant 0 : i32
    return %c0_i32, %c0_i32_0 : i32, i32
  }
  func.func @transform_2(%arg0: i32) -> (i32, i32) {
    %c0_i32 = arith.constant 0 : i32
    %c0_i32_0 = arith.constant 0 : i32
    %c0_i32_1 = arith.constant 0 : i32
    return %c0_i32, %c0_i32_0 : i32, i32
  }
  func.func @transform_3(%arg0: i32) -> (i32, i32) {
    %c0_i32 = arith.constant 0 : i32
    %c0_i32_0 = arith.constant 0 : i32
    %c0_i32_1 = arith.constant 0 : i32
    return %c0_i32, %c0_i32_0 : i32, i32
  }
  func.func @transform_4(%arg0: i32) -> (i32, i32) {
    %c0_i32 = arith.constant 0 : i32
    %c0_i32_0 = arith.constant 0 : i32
    return %arg0, %c0_i32 : i32, i32
  }
  func.func @transform_5(%arg0: i32) -> (i32, i32) {
    %c0_i32 = arith.constant 0 : i32
    %c0_i32_0 = arith.constant 0 : i32
    return %arg0, %c0_i32 : i32, i32
  }
}

</mosaic_0001>

<bundles_post_ra>
// kernel: tpu_custom_call.1
= control target key start
LH: loop header
LB: loop body
LE: loop exit
PB: predicated region body
PF: predicated region fallthrough
CT: control target
= control target key end

     0   :  { %11 = vsyncpa [#allocation3], 0  ;;  %s1463_s0 = inlined_call_operand.vmem [shape: bf16[256,32], index: 0, kind: input, shape index: {}]   ;;  %s1464_s1 = inlined_call_operand.vmem [shape: bf16[32,256], index: 1, kind: input, shape index: {}]   ;;  %s1465_s2 = inlined_call_operand.vmem [shape: bf16[128,128], index: 2, kind: input, shape index: {}]   ;;  %s1466_s3 = inlined_call_operand.vmem [shape: bf16[128,128], index: 3, kind: input, shape index: {}]   ;;  %s1467_s4 = inlined_call_operand.hbm [shape: bf16[256,128], index: 4, kind: output, shape index: {0}]   ;;  %s1468_s5 = inlined_call_operand.hbm [shape: bf16[256,128], index: 5, kind: output, shape index: {1}]  }
   0x1   :  { %13 = vsyncpa [#allocation3 + $0x1], 0 }
   0x2   :  { %14 = vsyncpa [#allocation5], 0 }
   0x3   :  { %16 = vsyncpa [#allocation5 + $0x1], 0  ;;  %s1248_s18 = smov 0   ;;  %s1250_s19 = smov 0  }
   0x4   :  { %s1252_s20 = smov 0   ;;  %s1254_s21 = smov 0  }
   0x5 LB: > { %s1269_s22 = sadd.s32 4294967295, %s1211_s21   ;;  %s852_s23 = sadd.s32 4294967294, %s1211_s21   ;;  %s1211_s21 = sphi %s1254_s21, %s1474_s21   ;;  %s1207_s20 = sphi %s1252_s20, %s1473_s20   ;;  %s1203_s19 = sphi %s1250_s19, %s1472_s19   ;;  %s1199_s18 = sphi %s1248_s18, %s1471_s18  }
   0x6   : > { %s1273_s24 = sadd.s32 1, %s1211_s21   ;;  %s118_s25 = sadd.s32 1, %s1207_s20 }
   0x7   : > { %s115_s26 = ssub.s32 %s1211_s21, %s1273_s24  ;;  %p128_p0 = scmp.ne.s32.totalorder %s1207_s20, %s1203_s19 }
   0x8   : > { %p116_p1 = scmp.eq.s32.totalorder %s115_s26, 0  ;;  %p129_p2 = scmp.eq.s32.totalorder %s1269_s22, 3 }
   0x9   : > { %p134_p3 = scmp.ne.s32.totalorder %s1203_s19, %s1199_s18  ;;  %p135_p4 = scmp.eq.s32.totalorder %s852_s23, 3 }
   0xa   : > { %s1284_s27 = scalar_select %p116_p1, %s1207_s20, %s118_s25  }
   0xb   : > { %p1286_p5 = por %p129_p2, %p128_p0  ;;  %p1290_p6 = por %p135_p4, %p134_p3 }
   0xc   : > { %p855_p7 = scmp.ge.s32.totalorder %s1211_s21, 1  ;;  %p197_p8 = scmp.lt.s32.totalorder %s1211_s21, 5 }
   0xe   : > { %p198_p9 = pnand %p855_p7, %p197_p8 }
   0xf   : > { %s858_s7 = sshll.u32 (!%p198_p9), %s1269_s22, 3  ;;  %s928_s9 = sshll.u32 (!%p198_p9), %s1269_s22, 9 }
  0x10   : > { %201 = sbr.rel (%p198_p9) target bundleno = 490 (0x1ea), region = 36  ;;  %p231_p10 = scmp.lt.s32.totalorder (!%p198_p9), %s858_s7, 31 }
  0x11   : > { %s1385_s11 = scalar_lea.hbm (!%p198_p9), %s1467_s4, %s928_s9  ;;  %s1393_s13 = scalar_lea.hbm (!%p198_p9), %s1468_s5, %s928_s9 }
  0x12   : > { %s1214_s16 = smov (!%p198_p9), [#allocation2]  }
  0x13   : > { %s1125_s17 = sshll.u32 (!%p198_p9), %s1214_s16, 4  ;;  %s1126_s17 = int_to_ptr.vmem [resolvable:$false] %s1125_s17 }
  0x15   : > { %v1095_v0 = vld [vmem:[%s1464_s1 + $0x14] ss:$8 sps:$4 sm:$0xff]   ;;  %v1097_v1 = vld [vmem:[%s1464_s1 + $0x10] ss:$8 sps:$4 sm:$0xff]   ;;  %v1213_v2 = vmov 0   ;;  %s1476_s7 = smov (!%p231_p10, %s858_s7), 31 }
  0x16   : > { %336 = vmatprep.mubr.bf16.mxu0 %v1213_v2  ;;  %316 = vmatprep.subr.bf16.mxu0 %v1095_v0  ;;  %v1098_v3 = vld [vmem:[%s1464_s1 + $0x4] ss:$8 sps:$4 sm:$0xff]   ;;  %v1100_v4 = vld [vmem:[%s1464_s1] ss:$8 sps:$4 sm:$0xff]   ;;  %v1105_v5 = vld [vmem:[%s1465_s2 + $0x38] sm:$0xff]   ;;  %s859_s23 = sshll.u32 %s1476_s7, 2 }
  0x17   : > { %317 = vmatpush1.bf16.msra.mxu0 %v1097_v1  ;;  %v1106_v6 = vld [vmem:[%s1466_s3 + $0x38] sm:$0xff]   ;;  %1000 = vmatprep.subr.bf16.mxu1 %v1105_v5  ;;  %v1107_v7 = vld [vmem:[%s1465_s2 + $0x30] sm:$0xff]   ;;  %s1321_s8 = scalar_lea.vmem %s1463_s0, %s859_s23  ;;  %vm291_vm0 = vcmask 261120   ;;  %v1109_v10 = vld [vmem:[%s1465_s2 + $0x28] sm:$0xff]   ;;  %s1371_s23 = sand.u32 1, %s1203_s19  }
  0x18   : > { %318 = vmatprep.subr.bf16.mxu0 %v1098_v3  ;;  %1001 = vmatpush3.bf16.msra.mxu1 %v1105_v5  ;;  %v1101_v8 = vld [vmem:[%s1321_s8] sm:$0xff]   ;;  %v1108_v9 = vld [vmem:[%s1466_s3 + $0x30] sm:$0xff]   ;;  %v1102_v11 = vld [vmem:[%s1321_s8 + $0x8] sm:$0xff]   ;;  %s856_s25 = sshll.u32 %s1371_s23, 5  ;;  %s724_s14 = scalar_lea.sflag [#allocation3], %s1371_s23 }
  0x19   : > { %1002 = vmatprep.subr.bf16.mxu1 %v1107_v7  ;;  %v1110_v12 = vld [vmem:[%s1466_s3 + $0x28] sm:$0xff]   ;;  %v1111_v13 = vld [vmem:[%s1465_s2 + $0x20] sm:$0xff]   ;;  %v1113_v15 = vld [vmem:[%s1465_s2 + $0x18] sm:$0xff]   ;;  %s222_s26 = scalar_lea.vmem [#allocation2], %s856_s25  ;;  %s1374_s30 = scalar_lea.vmem [#allocation4], %s856_s25 }
  0x1a   : > { %v1112_v14 = vld [vmem:[%s1466_s3 + $0x20] sm:$0xff]   ;;  %v1103_v16 = vld [vmem:[%s1321_s8 + $0x10] sm:$0xff]   ;;  %v1104_v17 = vld [vmem:[%s1321_s8 + $0x18] sm:$0xff]   ;;  %s742_s6 = sshll.u32 %s222_s26, 4  ;;  %s758_s7 = sshll.u32 %s1374_s30, 4  ;;  %s1379_s6 = int_to_ptr.vmem [resolvable:$true] %s742_s6  ;;  %s1387_s7 = int_to_ptr.vmem [resolvable:$true] %s758_s7 }
  0x1b   : > { %319 = vmatpush1.bf16.msra.mxu0 %v1100_v4  ;;  %v1114_v18 = vld [vmem:[%s1466_s3 + $0x18] sm:$0xff]   ;;  %v1115_v19 = vld [vmem:[%s1465_s2 + $0x10] sm:$0xff]   ;;  %v1117_v21 = vld [vmem:[%s1465_s2 + $0x8] sm:$0xff]   ;;  %s1121_s15 = scalar_lea.vmem %s1379_s6, 512  ;;  %s1127_s25 = scalar_lea.vmem %s1126_s17, 1024 }
  0x1c   : > { %1024 = vmatprep.subr.bf16.mxu0 %v1106_v6  ;;  %1003 = vmatpush3.bf16.msra.mxu1 %v1107_v7  ;;  %v1116_v20 = vld [vmem:[%s1466_s3 + $0x10] sm:$0xff]   ;;  %v1118_v22 = vld [vmem:[%s1466_s3 + $0x8] sm:$0xff]   ;;  %v1119_v23 = vld [vmem:[%s1465_s2] sm:$0xff]   ;;  %p1122_p11 = scmp.ne.s32.totalorder %s1379_s6, %s1121_s15  ;;  %p1128_p0 = scmp.lt.s32.totalorder %s1379_s6, %s1126_s17 }
  0x1d   : > { %1004 = vmatprep.subr.bf16.mxu1 %v1109_v10  ;;  %v1120_v24 = vld [vmem:[%s1466_s3] sm:$0xff]   ;;  %p1129_p1 = scmp.lt.s32.totalorder %s1127_s25, %s1121_s15 }
  0x1e   : > { %868 = vmatmul.mubr.msk.bf16.vlgmr.msra.gmra.mxu0 %vm291_vm0, %v1101_v8  ;;  %p1123_p12 = pnand %p1122_p11, %p1286_p5 }
  0x1f   : > { %346 = vmatprep.mubr.bf16.mxu0 %v1213_v2  ;;  %1025 = vmatpush3.bf16.msra.mxu0 %v1106_v6  ;;  %p1130_p2 = por %p1129_p1, %p1128_p0 }
  0x20   : > { %1026 = vmatprep.subr.bf16.mxu0 %v1108_v9  ;;  %1005 = vmatpush3.bf16.msra.mxu1 %v1109_v10  ;;  %p1124_p13 = pneg %p1123_p12 }
  0x21   : > { %1006 = vmatprep.subr.bf16.mxu1 %v1111_v13 }
  0x22   : > { %p1131_p3 = pnand %p1130_p2, %p1124_p13 }
  0x23   : > { %1027 = vmatpush3.bf16.msra.mxu0 %v1108_v9 }
  0x24   : > { %1028 = vmatprep.subr.bf16.mxu0 %v1110_v12  ;;  %1007 = vmatpush3.bf16.msra.mxu1 %v1111_v13 }
  0x25   : > { %1008 = vmatprep.subr.bf16.mxu1 %v1113_v15 }
  0x26   : > { %869 = vmatmul.mubr.msk.bf16.gmra.mxu0 %vm291_vm0, %v1102_v11 }
  0x27   : > { %356 = vmatprep.mubr.bf16.mxu0 %v1213_v2  ;;  %1029 = vmatpush3.bf16.msra.mxu0 %v1110_v12 }
  0x28   : > { %1030 = vmatprep.subr.bf16.mxu0 %v1112_v14  ;;  %1009 = vmatpush3.bf16.msra.mxu1 %v1113_v15 }
  0x29   : > { %1010 = vmatprep.subr.bf16.mxu1 %v1115_v19 }
  0x2b   : > { %1031 = vmatpush3.bf16.msra.mxu0 %v1112_v14 }
  0x2c   : > { %1032 = vmatprep.subr.bf16.mxu0 %v1114_v18  ;;  %1011 = vmatpush3.bf16.msra.mxu1 %v1115_v19 }
  0x2d   : > { %1012 = vmatprep.subr.bf16.mxu1 %v1117_v21 }
  0x2e   : > { %870 = vmatmul.mubr.msk.bf16.gmra.mxu0 %vm291_vm0, %v1103_v16 }
  0x2f   : > { %366 = vmatprep.mubr.bf16.mxu0 %v1213_v2  ;;  %1033 = vmatpush3.bf16.msra.mxu0 %v1114_v18 }
  0x30   : > { %1034 = vmatprep.subr.bf16.mxu0 %v1116_v20  ;;  %1013 = vmatpush3.bf16.msra.mxu1 %v1117_v21 }
  0x31   : > { %1014 = vmatprep.subr.bf16.mxu1 %v1119_v23 }
  0x33   : > { %1035 = vmatpush3.bf16.msra.mxu0 %v1116_v20 }
  0x34   : > { %1036 = vmatprep.subr.bf16.mxu0 %v1118_v22  ;;  %1015 = vmatpush3.bf16.msra.mxu1 %v1119_v23 }
  0x36   : > { %871 = vmatmul.mubr.msk.bf16.gmra.mxu0 %vm291_vm0, %v1104_v17 }
  0x37   : > { %1037 = vmatpush3.bf16.msra.mxu0 %v1118_v22 }
  0x38   : > { %1038 = vmatprep.subr.bf16.mxu0 %v1120_v24 }
  0x3b   : > { %1039 = vmatpush3.bf16.msra.mxu0 %v1120_v24 }
  0xde   : > { %v338_v25 = vpop.f32.mrf.mxu0 }
  0xe0   : > { %v340_v26 = vpop.f32.mrf.mxu0 }
  0xe2   : > { %v342_v27 = vpop.f32.mrf.mxu0 }
  0xe3   : > { %v377_v28 = vpack.c.bf16 %v342_v27, %v338_v25 }
  0xe4   : > { %v344_v29 = vpop.f32.mrf.mxu0 }
  0xe5   : > { %v381_v30 = vpack.c.bf16 %v344_v29, %v340_v26  ;;  %1016 = vmatprep.mubr.bf16.mxu1 %v377_v28 }
  0xe6   : > { %v348_v31 = vpop.f32.mrf.mxu0 }
  0xe7   : > { %1040 = vmatprep.mubr.bf16.mxu0 %v381_v30 }
  0xe8   : > { %v350_v32 = vpop.f32.mrf.mxu0 }
  0xea   : > { %v352_v33 = vpop.f32.mrf.mxu0 }
  0xeb   : > { %v378_v34 = vpack.c.bf16 %v352_v33, %v348_v31 }
  0xec   : > { %v354_v35 = vpop.f32.mrf.mxu0 }
  0xed   : > { %v382_v36 = vpack.c.bf16 %v354_v35, %v350_v32  ;;  %1017 = vmatmul.mubr.bf16.vlgmr.msra.gmra.mxu1 %v378_v34 }
  0xee   : > { %v358_v37 = vpop.f32.mrf.mxu0 }
  0xef   : > { %1041 = vmatmul.mubr.bf16.vlgmr.msra.gmra.mxu0 %v382_v36 }
  0xf0   : > { %v360_v38 = vpop.f32.mrf.mxu0 }
  0xf2   : > { %v362_v39 = vpop.f32.mrf.mxu0 }
  0xf3   : > { %v379_v40 = vpack.c.bf16 %v362_v39, %v358_v37 }
  0xf4   : > { %v364_v41 = vpop.f32.mrf.mxu0 }
  0xf5   : > { %v383_v42 = vpack.c.bf16 %v364_v41, %v360_v38  ;;  %1020 = vmatprep.mubr.bf16.mxu1 %v379_v40 }
  0xf6   : > { %v368_v43 = vpop.f32.mrf.mxu0 }
  0xf7   : > { %1044 = vmatprep.mubr.bf16.mxu0 %v383_v42 }
  0xf8   : > { %v370_v44 = vpop.f32.mrf.mxu0 }
  0xfa   : > { %v372_v45 = vpop.f32.mrf.mxu0 }
  0xfb   : > { %v380_v46 = vpack.c.bf16 %v372_v45, %v368_v43 }
  0xfc   : > { %v374_v47 = vpop.f32.mrf.mxu0 }
  0xfd   : > { %v384_v48 = vpack.c.bf16 %v374_v47, %v370_v44  ;;  %1021 = vmatmul.mubr.bf16.gmra.mxu1 %v380_v46 }
  0xff   : > { %1045 = vmatmul.mubr.bf16.gmra.mxu0 %v384_v48 }
 0x1ad   : > { %v1018_v49 = vpop.f32.mrf.mxu1 }
 0x1af   : > { %v483_v50 = vpop.f32.mrf.mxu1  ;;  %v1042_v51 = vpop.f32.mrf.mxu0 }
 0x1b1   : > { %v1019_v52 = vpop.f32.mrf.mxu1  ;;  %v652_v53 = vpop.f32.mrf.mxu0 }
 0x1b2   : > { %v938_v54 = vpack.c.bf16 %v1019_v52, %v1018_v49 }
 0x1b3   : > { %v486_v55 = vpop.f32.mrf.mxu1  ;;  %v1043_v56 = vpop.f32.mrf.mxu0 }
 0x1b4   : > { %970 = vst [vmem:[%s222_s26 + $0x8] sm:$0xff] %v938_v54   ;;  %v933_v57 = vpack.c.bf16 %v486_v55, %v483_v50  ;;  %v958_v58 = vpack.c.bf16 %v1043_v56, %v1042_v51 }
 0x1b5   : > { %v655_v59 = vpop.f32.mrf.mxu0 }
 0x1b6   : > { %934 = vst [vmem:[%s222_s26] sm:$0xff] %v933_v57   ;;  %973 = vst [vmem:[%s1374_s30 + $0x8] sm:$0xff] %v958_v58   ;;  %v953_v60 = vpack.c.bf16 %v655_v59, %v652_v53 }
 0x1b8   : > { %954 = vst [vmem:[%s1374_s30] sm:$0xff] %v953_v60  }
 0x1bd   : > { %v1022_v61 = vpop.f32.mrf.mxu1 }
 0x1bf   : > { %v499_v62 = vpop.f32.mrf.mxu1  ;;  %v1046_v63 = vpop.f32.mrf.mxu0 }
 0x1c1   : > { %v1023_v0 = vpop.f32.mrf.mxu1  ;;  %v668_v1 = vpop.f32.mrf.mxu0 }
 0x1c2   : > { %v948_v2 = vpack.c.bf16 %v1023_v0, %v1022_v61 }
 0x1c3   : > { %v502_v3 = vpop.f32.mrf.mxu1  ;;  %v1047_v4 = vpop.f32.mrf.mxu0 }
 0x1c4   : > { %972 = vst [vmem:[%s222_s26 + $0x18] sm:$0xff] %v948_v2   ;;  %v943_v5 = vpack.c.bf16 %v502_v3, %v499_v62  ;;  %v968_v6 = vpack.c.bf16 %v1047_v4, %v1046_v63 }
 0x1c5   : > { %v671_v7 = vpop.f32.mrf.mxu0 }
 0x1c6   : > { %971 = vst [vmem:[%s222_s26 + $0x10] sm:$0xff] %v943_v5   ;;  %975 = vst [vmem:[%s1374_s30 + $0x18] sm:$0xff] %v968_v6   ;;  %v963_v8 = vpack.c.bf16 %v671_v7, %v668_v1 }
 0x1c7   : > { %1134 = shalt.err (!%p1131_p3)
}
 0x1c8   : > { %s1135_s26 = scalar_lea.hbm %s1385_s11, 512  ;;  %s1139_s8 = scalar_lea.hbm %s1467_s4, 2048 }
 0x1c9   : > { %p1136_p4 = scmp.ne.s32.totalorder %s1385_s11, %s1135_s26  ;;  %p1140_p9 = scmp.lt.s32.totalorder %s1385_s11, %s1467_s4 }
 0x1ca   : > { %p1141_p10 = scmp.lt.s32.totalorder %s1139_s8, %s1135_s26 }
 0x1cb   : > { %p1137_p7 = pnand %p1136_p4, %p1286_p5 }
 0x1cc   : > { %p1142_p11 = por %p1141_p10, %p1140_p9 }
 0x1cd   : > { %p1138_p8 = pneg %p1137_p7 }
 0x1cf   : > { %p1143_p12 = pnand %p1142_p11, %p1138_p8 }
 0x1d1   : > { %1146 = shalt.err (!%p1143_p12)
}
 0x1d2   : > { %s1215_s15 = smov 64   ;;  %s1216_s16 = smov 4   ;;  %974 = vst [vmem:[%s1374_s30 + $0x10] sm:$0xff] %v963_v8  }
 0x1d3   : > { %1048 = dma.vmem_to_hbm [thread:$0]  (%p1286_p5), %s1379_s6, 512, %s1385_s11, %s724_s14, %s1215_s15, %s1215_s15, %s1216_s16  }
 0x1d4   : > { %s729_s17 = scalar_lea.sflag [#allocation5], %s1371_s23  ;;  %s1147_s25 = scalar_lea.vmem %s1387_s7, 512 }
 0x1d5   : > { %p1148_p13 = scmp.ne.s32.totalorder %s1387_s7, %s1147_s25  ;;  %s1217_s26 = smov [#allocation4]  }
 0x1d6   : > { %s1151_s9 = sshll.u32 %s1217_s26, 4  ;;  %s1152_s9 = int_to_ptr.vmem [resolvable:$false] %s1151_s9 }
 0x1d7   : > { %p1149_p0 = pnand %p1148_p13, %p1286_p5  ;;  %s1153_s10 = scalar_lea.vmem %s1152_s9, 1024 }
 0x1d8   : > { %p1154_p2 = scmp.lt.s32.totalorder %s1387_s7, %s1152_s9  ;;  %p1155_p3 = scmp.lt.s32.totalorder %s1153_s10, %s1147_s25 }
 0x1d9   : > { %p1150_p1 = pneg %p1149_p0 }
 0x1da   : > { %p1156_p4 = por %p1155_p3, %p1154_p2 }
 0x1dc   : > { %p1157_p7 = pnand %p1156_p4, %p1150_p1 }
 0x1de   : > { %1160 = shalt.err (!%p1157_p7)
}
 0x1df   : > { %s1161_s30 = scalar_lea.hbm %s1393_s13, 512  ;;  %s1165_s11 = scalar_lea.hbm %s1468_s5, 2048 }
 0x1e0   : > { %p1162_p8 = scmp.ne.s32.totalorder %s1393_s13, %s1161_s30  ;;  %p1166_p11 = scmp.lt.s32.totalorder %s1393_s13, %s1468_s5 }
 0x1e1   : > { %p1167_p12 = scmp.lt.s32.totalorder %s1165_s11, %s1161_s30 }
 0x1e2   : > { %p1163_p9 = pnand %p1162_p8, %p1286_p5 }
 0x1e3   : > { %p1168_p13 = por %p1167_p12, %p1166_p11 }
 0x1e4   : > { %p1164_p10 = pneg %p1163_p9 }
 0x1e6   : > { %p1169_p0 = pnand %p1168_p13, %p1164_p10 }
 0x1e8   : > { %1172 = shalt.err (!%p1169_p0)
}
 0x1e9   : > { %1049 = dma.vmem_to_hbm [thread:$0]  (%p1286_p5), %s1387_s7, 512, %s1393_s13, %s729_s17, %s1215_s15, %s1215_s15, %s1216_s16  }
 0x1ea PF: > { %p1059_p1 = scmp.ge.s32.totalorder %s1211_s21, 2  ;;  %s773_s22 = sand.u32 1, %s1199_s18  }
 0x1eb   : > { %s774_s12 = scalar_lea.sflag [#allocation3], %s773_s22 }
 0x1ec   : > { %p1053_p2 = pnand %p1059_p1, %p1290_p6 }
 0x1ee   : > { %p1054_p3 = pneg %p1053_p2 }
 0x1f0   : > { %1190 = dma.done.wait (%p1054_p3), %s774_s12, 512  }
 0x1f1   : > { %1192 = vsyncadd (%p1054_p3), %s774_s12, 4294966784  ;;  %s783_s25 = scalar_lea.sflag [#allocation5], %s773_s22 }
 0x1f2   : > { %1194 = dma.done.wait (%p1054_p3), %s783_s25, 512  }
 0x1f3   : > { %1196 = vsyncadd (%p1054_p3), %s783_s25, 4294966784  ;;  %p19_p5 = scmp.ge.s32.totalorder %s1273_s24, 6   ;;  %s1471_s18 = smov %s1203_s19 }
 0x1f4   : > { %s1472_s19 = smov %s1207_s20  ;;  %s1473_s20 = smov %s1284_s27 }
 0x1f5   : > { %s1474_s21 = smov %s1273_s24  ;;  %21 = sbr.rel (!%p19_p5) target bundleno = 5 (0x5), region = 88 }
 0x1fa   :  { %788 = vsyncpa [#allocation3], 1 }
 0x1fb   :  { %790 = vsyncpa [#allocation3 + $0x1], 1 }
 0x1fc   :  { %791 = vsyncpa [#allocation5], 1 }
 0x1fd   :  { %793 = vsyncpa [#allocation5 + $0x1], 1 }

// kernel: tpu_custom_call.1
= control target key start
LH: loop header
LB: loop body
LE: loop exit
PB: predicated region body
PF: predicated region fallthrough
CT: control target
= control target key end

     0   :  { %11 = vsyncpa [#allocation3], 0  ;;  %s1463_s0 = inlined_call_operand.vmem [shape: bf16[256,32], index: 0, kind: input, shape index: {}]   ;;  %s1464_s1 = inlined_call_operand.vmem [shape: bf16[32,256], index: 1, kind: input, shape index: {}]   ;;  %s1465_s2 = inlined_call_operand.vmem [shape: bf16[128,128], index: 2, kind: input, shape index: {}]   ;;  %s1466_s3 = inlined_call_operand.vmem [shape: bf16[128,128], index: 3, kind: input, shape index: {}]   ;;  %s1467_s4 = inlined_call_operand.hbm [shape: bf16[256,128], index: 4, kind: output, shape index: {0}]   ;;  %s1468_s5 = inlined_call_operand.hbm [shape: bf16[256,128], index: 5, kind: output, shape index: {1}]  }
   0x1   :  { %13 = vsyncpa [#allocation3 + $0x1], 0 }
   0x2   :  { %14 = vsyncpa [#allocation5], 0 }
   0x3   :  { %16 = vsyncpa [#allocation5 + $0x1], 0  ;;  %s1248_s18 = smov 0   ;;  %s1250_s19 = smov 0  }
   0x4   :  { %s1252_s20 = smov 0   ;;  %s1254_s21 = smov 0  }
   0x5 LB: > { %s1269_s22 = sadd.s32 4294967295, %s1211_s21   ;;  %s852_s23 = sadd.s32 4294967294, %s1211_s21   ;;  %s1211_s21 = sphi %s1254_s21, %s1474_s21   ;;  %s1207_s20 = sphi %s1252_s20, %s1473_s20   ;;  %s1203_s19 = sphi %s1250_s19, %s1472_s19   ;;  %s1199_s18 = sphi %s1248_s18, %s1471_s18  }
   0x6   : > { %s1273_s24 = sadd.s32 1, %s1211_s21   ;;  %s118_s25 = sadd.s32 1, %s1207_s20 }
   0x7   : > { %s115_s26 = ssub.s32 %s1211_s21, %s1273_s24  ;;  %p128_p0 = scmp.ne.s32.totalorder %s1207_s20, %s1203_s19 }
   0x8   : > { %p116_p1 = scmp.eq.s32.totalorder %s115_s26, 0  ;;  %p129_p2 = scmp.eq.s32.totalorder %s1269_s22, 3 }
   0x9   : > { %p134_p3 = scmp.ne.s32.totalorder %s1203_s19, %s1199_s18  ;;  %p135_p4 = scmp.eq.s32.totalorder %s852_s23, 3 }
   0xa   : > { %s1284_s27 = scalar_select %p116_p1, %s1207_s20, %s118_s25  }
   0xb   : > { %p1286_p5 = por %p129_p2, %p128_p0  ;;  %p1290_p6 = por %p135_p4, %p134_p3 }
   0xc   : > { %p855_p7 = scmp.ge.s32.totalorder %s1211_s21, 1  ;;  %p197_p8 = scmp.lt.s32.totalorder %s1211_s21, 5 }
   0xe   : > { %p198_p9 = pnand %p855_p7, %p197_p8 }
   0xf   : > { %s858_s7 = sshll.u32 (!%p198_p9), %s1269_s22, 3  ;;  %s928_s9 = sshll.u32 (!%p198_p9), %s1269_s22, 9 }
  0x10   : > { %201 = sbr.rel (%p198_p9) target bundleno = 490 (0x1ea), region = 36  ;;  %p231_p10 = scmp.lt.s32.totalorder (!%p198_p9), %s858_s7, 31 }
  0x11   : > { %s1385_s11 = scalar_lea.hbm (!%p198_p9), %s1467_s4, %s928_s9  ;;  %s1393_s13 = scalar_lea.hbm (!%p198_p9), %s1468_s5, %s928_s9 }
  0x12   : > { %s1214_s16 = smov (!%p198_p9), [#allocation2]  }
  0x13   : > { %s1125_s17 = sshll.u32 (!%p198_p9), %s1214_s16, 4  ;;  %s1126_s17 = int_to_ptr.vmem [resolvable:$false] %s1125_s17 }
  0x15   : > { %v1095_v0 = vld [vmem:[%s1464_s1 + $0x14] ss:$8 sps:$4 sm:$0xff]   ;;  %v1097_v1 = vld [vmem:[%s1464_s1 + $0x10] ss:$8 sps:$4 sm:$0xff]   ;;  %v1213_v2 = vmov 0   ;;  %s1476_s7 = smov (!%p231_p10, %s858_s7), 31 }
  0x16   : > { %336 = vmatprep.mubr.bf16.mxu0 %v1213_v2  ;;  %316 = vmatprep.subr.bf16.mxu0 %v1095_v0  ;;  %v1098_v3 = vld [vmem:[%s1464_s1 + $0x4] ss:$8 sps:$4 sm:$0xff]   ;;  %v1100_v4 = vld [vmem:[%s1464_s1] ss:$8 sps:$4 sm:$0xff]   ;;  %v1105_v5 = vld [vmem:[%s1465_s2 + $0x38] sm:$0xff]   ;;  %s859_s23 = sshll.u32 %s1476_s7, 2 }
  0x17   : > { %317 = vmatpush1.bf16.msra.mxu0 %v1097_v1  ;;  %v1106_v6 = vld [vmem:[%s1466_s3 + $0x38] sm:$0xff]   ;;  %1000 = vmatprep.subr.bf16.mxu1 %v1105_v5  ;;  %v1107_v7 = vld [vmem:[%s1465_s2 + $0x30] sm:$0xff]   ;;  %s1321_s8 = scalar_lea.vmem %s1463_s0, %s859_s23  ;;  %vm291_vm0 = vcmask 261120   ;;  %v1109_v10 = vld [vmem:[%s1465_s2 + $0x28] sm:$0xff]   ;;  %s1371_s23 = sand.u32 1, %s1203_s19  }
  0x18   : > { %318 = vmatprep.subr.bf16.mxu0 %v1098_v3  ;;  %1001 = vmatpush3.bf16.msra.mxu1 %v1105_v5  ;;  %v1101_v8 = vld [vmem:[%s1321_s8] sm:$0xff]   ;;  %v1108_v9 = vld [vmem:[%s1466_s3 + $0x30] sm:$0xff]   ;;  %v1102_v11 = vld [vmem:[%s1321_s8 + $0x8] sm:$0xff]   ;;  %s856_s25 = sshll.u32 %s1371_s23, 5  ;;  %s724_s14 = scalar_lea.sflag [#allocation3], %s1371_s23 }
  0x19   : > { %1002 = vmatprep.subr.bf16.mxu1 %v1107_v7  ;;  %v1110_v12 = vld [vmem:[%s1466_s3 + $0x28] sm:$0xff]   ;;  %v1111_v13 = vld [vmem:[%s1465_s2 + $0x20] sm:$0xff]   ;;  %v1113_v15 = vld [vmem:[%s1465_s2 + $0x18] sm:$0xff]   ;;  %s222_s26 = scalar_lea.vmem [#allocation2], %s856_s25  ;;  %s1374_s30 = scalar_lea.vmem [#allocation4], %s856_s25 }
  0x1a   : > { %v1112_v14 = vld [vmem:[%s1466_s3 + $0x20] sm:$0xff]   ;;  %v1103_v16 = vld [vmem:[%s1321_s8 + $0x10] sm:$0xff]   ;;  %v1104_v17 = vld [vmem:[%s1321_s8 + $0x18] sm:$0xff]   ;;  %s742_s6 = sshll.u32 %s222_s26, 4  ;;  %s758_s7 = sshll.u32 %s1374_s30, 4  ;;  %s1379_s6 = int_to_ptr.vmem [resolvable:$true] %s742_s6  ;;  %s1387_s7 = int_to_ptr.vmem [resolvable:$true] %s758_s7 }
  0x1b   : > { %319 = vmatpush1.bf16.msra.mxu0 %v1100_v4  ;;  %v1114_v18 = vld [vmem:[%s1466_s3 + $0x18] sm:$0xff]   ;;  %v1115_v19 = vld [vmem:[%s1465_s2 + $0x10] sm:$0xff]   ;;  %v1117_v21 = vld [vmem:[%s1465_s2 + $0x8] sm:$0xff]   ;;  %s1121_s15 = scalar_lea.vmem %s1379_s6, 512  ;;  %s1127_s25 = scalar_lea.vmem %s1126_s17, 1024 }
  0x1c   : > { %1024 = vmatprep.subr.bf16.mxu0 %v1106_v6  ;;  %1003 = vmatpush3.bf16.msra.mxu1 %v1107_v7  ;;  %v1116_v20 = vld [vmem:[%s1466_s3 + $0x10] sm:$0xff]   ;;  %v1118_v22 = vld [vmem:[%s1466_s3 + $0x8] sm:$0xff]   ;;  %v1119_v23 = vld [vmem:[%s1465_s2] sm:$0xff]   ;;  %p1122_p11 = scmp.ne.s32.totalorder %s1379_s6, %s1121_s15  ;;  %p1128_p0 = scmp.lt.s32.totalorder %s1379_s6, %s1126_s17 }
  0x1d   : > { %1004 = vmatprep.subr.bf16.mxu1 %v1109_v10  ;;  %v1120_v24 = vld [vmem:[%s1466_s3] sm:$0xff]   ;;  %p1129_p1 = scmp.lt.s32.totalorder %s1127_s25, %s1121_s15 }
  0x1e   : > { %868 = vmatmul.mubr.msk.bf16.vlgmr.msra.gmra.mxu0 %vm291_vm0, %v1101_v8  ;;  %p1123_p12 = pnand %p1122_p11, %p1286_p5 }
  0x1f   : > { %346 = vmatprep.mubr.bf16.mxu0 %v1213_v2  ;;  %1025 = vmatpush3.bf16.msra.mxu0 %v1106_v6  ;;  %p1130_p2 = por %p1129_p1, %p1128_p0 }
  0x20   : > { %1026 = vmatprep.subr.bf16.mxu0 %v1108_v9  ;;  %1005 = vmatpush3.bf16.msra.mxu1 %v1109_v10  ;;  %p1124_p13 = pneg %p1123_p12 }
  0x21   : > { %1006 = vmatprep.subr.bf16.mxu1 %v1111_v13 }
  0x22   : > { %p1131_p3 = pnand %p1130_p2, %p1124_p13 }
  0x23   : > { %1027 = vmatpush3.bf16.msra.mxu0 %v1108_v9 }
  0x24   : > { %1028 = vmatprep.subr.bf16.mxu0 %v1110_v12  ;;  %1007 = vmatpush3.bf16.msra.mxu1 %v1111_v13 }
  0x25   : > { %1008 = vmatprep.subr.bf16.mxu1 %v1113_v15 }
  0x26   : > { %869 = vmatmul.mubr.msk.bf16.gmra.mxu0 %vm291_vm0, %v1102_v11 }
  0x27   : > { %356 = vmatprep.mubr.bf16.mxu0 %v1213_v2  ;;  %1029 = vmatpush3.bf16.msra.mxu0 %v1110_v12 }
  0x28   : > { %1030 = vmatprep.subr.bf16.mxu0 %v1112_v14  ;;  %1009 = vmatpush3.bf16.msra.mxu1 %v1113_v15 }
  0x29   : > { %1010 = vmatprep.subr.bf16.mxu1 %v1115_v19 }
  0x2b   : > { %1031 = vmatpush3.bf16.msra.mxu0 %v1112_v14 }
  0x2c   : > { %1032 = vmatprep.subr.bf16.mxu0 %v1114_v18  ;;  %1011 = vmatpush3.bf16.msra.mxu1 %v1115_v19 }
  0x2d   : > { %1012 = vmatprep.subr.bf16.mxu1 %v1117_v21 }
  0x2e   : > { %870 = vmatmul.mubr.msk.bf16.gmra.mxu0 %vm291_vm0, %v1103_v16 }
  0x2f   : > { %366 = vmatprep.mubr.bf16.mxu0 %v1213_v2  ;;  %1033 = vmatpush3.bf16.msra.mxu0 %v1114_v18 }
  0x30   : > { %1034 = vmatprep.subr.bf16.mxu0 %v1116_v20  ;;  %1013 = vmatpush3.bf16.msra.mxu1 %v1117_v21 }
  0x31   : > { %1014 = vmatprep.subr.bf16.mxu1 %v1119_v23 }
  0x33   : > { %1035 = vmatpush3.bf16.msra.mxu0 %v1116_v20 }
  0x34   : > { %1036 = vmatprep.subr.bf16.mxu0 %v1118_v22  ;;  %1015 = vmatpush3.bf16.msra.mxu1 %v1119_v23 }
  0x36   : > { %871 = vmatmul.mubr.msk.bf16.gmra.mxu0 %vm291_vm0, %v1104_v17 }
  0x37   : > { %1037 = vmatpush3.bf16.msra.mxu0 %v1118_v22 }
  0x38   : > { %1038 = vmatprep.subr.bf16.mxu0 %v1120_v24 }
  0x3b   : > { %1039 = vmatpush3.bf16.msra.mxu0 %v1120_v24 }
  0xde   : > { %v338_v25 = vpop.f32.mrf.mxu0 }
  0xe0   : > { %v340_v26 = vpop.f32.mrf.mxu0 }
  0xe2   : > { %v342_v27 = vpop.f32.mrf.mxu0 }
  0xe3   : > { %v377_v28 = vpack.c.bf16 %v342_v27, %v338_v25 }
  0xe4   : > { %v344_v29 = vpop.f32.mrf.mxu0 }
  0xe5   : > { %v381_v30 = vpack.c.bf16 %v344_v29, %v340_v26  ;;  %1016 = vmatprep.mubr.bf16.mxu1 %v377_v28 }
  0xe6   : > { %v348_v31 = vpop.f32.mrf.mxu0 }
  0xe7   : > { %1040 = vmatprep.mubr.bf16.mxu0 %v381_v30 }
  0xe8   : > { %v350_v32 = vpop.f32.mrf.mxu0 }
  0xea   : > { %v352_v33 = vpop.f32.mrf.mxu0 }
  0xeb   : > { %v378_v34 = vpack.c.bf16 %v352_v33, %v348_v31 }
  0xec   : > { %v354_v35 = vpop.f32.mrf.mxu0 }
  0xed   : > { %v382_v36 = vpack.c.bf16 %v354_v35, %v350_v32  ;;  %1017 = vmatmul.mubr.bf16.vlgmr.msra.gmra.mxu1 %v378_v34 }
  0xee   : > { %v358_v37 = vpop.f32.mrf.mxu0 }
  0xef   : > { %1041 = vmatmul.mubr.bf16.vlgmr.msra.gmra.mxu0 %v382_v36 }
  0xf0   : > { %v360_v38 = vpop.f32.mrf.mxu0 }
  0xf2   : > { %v362_v39 = vpop.f32.mrf.mxu0 }
  0xf3   : > { %v379_v40 = vpack.c.bf16 %v362_v39, %v358_v37 }
  0xf4   : > { %v364_v41 = vpop.f32.mrf.mxu0 }
  0xf5   : > { %v383_v42 = vpack.c.bf16 %v364_v41, %v360_v38  ;;  %1020 = vmatprep.mubr.bf16.mxu1 %v379_v40 }
  0xf6   : > { %v368_v43 = vpop.f32.mrf.mxu0 }
  0xf7   : > { %1044 = vmatprep.mubr.bf16.mxu0 %v383_v42 }
  0xf8   : > { %v370_v44 = vpop.f32.mrf.mxu0 }
  0xfa   : > { %v372_v45 = vpop.f32.mrf.mxu0 }
  0xfb   : > { %v380_v46 = vpack.c.bf16 %v372_v45, %v368_v43 }
  0xfc   : > { %v374_v47 = vpop.f32.mrf.mxu0 }
  0xfd   : > { %v384_v48 = vpack.c.bf16 %v374_v47, %v370_v44  ;;  %1021 = vmatmul.mubr.bf16.gmra.mxu1 %v380_v46 }
  0xff   : > { %1045 = vmatmul.mubr.bf16.gmra.mxu0 %v384_v48 }
 0x1ad   : > { %v1018_v49 = vpop.f32.mrf.mxu1 }
 0x1af   : > { %v483_v50 = vpop.f32.mrf.mxu1  ;;  %v1042_v51 = vpop.f32.mrf.mxu0 }
 0x1b1   : > { %v1019_v52 = vpop.f32.mrf.mxu1  ;;  %v652_v53 = vpop.f32.mrf.mxu0 }
 0x1b2   : > { %v938_v54 = vpack.c.bf16 %v1019_v52, %v1018_v49 }
 0x1b3   : > { %v486_v55 = vpop.f32.mrf.mxu1  ;;  %v1043_v56 = vpop.f32.mrf.mxu0 }
 0x1b4   : > { %970 = vst [vmem:[%s222_s26 + $0x8] sm:$0xff] %v938_v54   ;;  %v933_v57 = vpack.c.bf16 %v486_v55, %v483_v50  ;;  %v958_v58 = vpack.c.bf16 %v1043_v56, %v1042_v51 }
 0x1b5   : > { %v655_v59 = vpop.f32.mrf.mxu0 }
 0x1b6   : > { %934 = vst [vmem:[%s222_s26] sm:$0xff] %v933_v57   ;;  %973 = vst [vmem:[%s1374_s30 + $0x8] sm:$0xff] %v958_v58   ;;  %v953_v60 = vpack.c.bf16 %v655_v59, %v652_v53 }
 0x1b8   : > { %954 = vst [vmem:[%s1374_s30] sm:$0xff] %v953_v60  }
 0x1bd   : > { %v1022_v61 = vpop.f32.mrf.mxu1 }
 0x1bf   : > { %v499_v62 = vpop.f32.mrf.mxu1  ;;  %v1046_v63 = vpop.f32.mrf.mxu0 }
 0x1c1   : > { %v1023_v0 = vpop.f32.mrf.mxu1  ;;  %v668_v1 = vpop.f32.mrf.mxu0 }
 0x1c2   : > { %v948_v2 = vpack.c.bf16 %v1023_v0, %v1022_v61 }
 0x1c3   : > { %v502_v3 = vpop.f32.mrf.mxu1  ;;  %v1047_v4 = vpop.f32.mrf.mxu0 }
 0x1c4   : > { %972 = vst [vmem:[%s222_s26 + $0x18] sm:$0xff] %v948_v2   ;;  %v943_v5 = vpack.c.bf16 %v502_v3, %v499_v62  ;;  %v968_v6 = vpack.c.bf16 %v1047_v4, %v1046_v63 }
 0x1c5   : > { %v671_v7 = vpop.f32.mrf.mxu0 }
 0x1c6   : > { %971 = vst [vmem:[%s222_s26 + $0x10] sm:$0xff] %v943_v5   ;;  %975 = vst [vmem:[%s1374_s30 + $0x18] sm:$0xff] %v968_v6   ;;  %v963_v8 = vpack.c.bf16 %v671_v7, %v668_v1 }
 0x1c7   : > { %1134 = shalt.err (!%p1131_p3)
}
 0x1c8   : > { %s1135_s26 = scalar_lea.hbm %s1385_s11, 512  ;;  %s1139_s8 = scalar_lea.hbm %s1467_s4, 2048 }
 0x1c9   : > { %p1136_p4 = scmp.ne.s32.totalorder %s1385_s11, %s1135_s26  ;;  %p1140_p9 = scmp.lt.s32.totalorder %s1385_s11, %s1467_s4 }
 0x1ca   : > { %p1141_p10 = scmp.lt.s32.totalorder %s1139_s8, %s1135_s26 }
 0x1cb   : > { %p1137_p7 = pnand %p1136_p4, %p1286_p5 }
 0x1cc   : > { %p1142_p11 = por %p1141_p10, %p1140_p9 }
 0x1cd   : > { %p1138_p8 = pneg %p1137_p7 }
 0x1cf   : > { %p1143_p12 = pnand %p1142_p11, %p1138_p8 }
 0x1d1   : > { %1146 = shalt.err (!%p1143_p12)
}
 0x1d2   : > { %s1215_s15 = smov 64   ;;  %s1216_s16 = smov 4   ;;  %974 = vst [vmem:[%s1374_s30 + $0x10] sm:$0xff] %v963_v8  }
 0x1d3   : > { %1048 = dma.vmem_to_hbm [thread:$0]  (%p1286_p5), %s1379_s6, 512, %s1385_s11, %s724_s14, %s1215_s15, %s1215_s15, %s1216_s16  }
 0x1d4   : > { %s729_s17 = scalar_lea.sflag [#allocation5], %s1371_s23  ;;  %s1147_s25 = scalar_lea.vmem %s1387_s7, 512 }
 0x1d5   : > { %p1148_p13 = scmp.ne.s32.totalorder %s1387_s7, %s1147_s25  ;;  %s1217_s26 = smov [#allocation4]  }
 0x1d6   : > { %s1151_s9 = sshll.u32 %s1217_s26, 4  ;;  %s1152_s9 = int_to_ptr.vmem [resolvable:$false] %s1151_s9 }
 0x1d7   : > { %p1149_p0 = pnand %p1148_p13, %p1286_p5  ;;  %s1153_s10 = scalar_lea.vmem %s1152_s9, 1024 }
 0x1d8   : > { %p1154_p2 = scmp.lt.s32.totalorder %s1387_s7, %s1152_s9  ;;  %p1155_p3 = scmp.lt.s32.totalorder %s1153_s10, %s1147_s25 }
 0x1d9   : > { %p1150_p1 = pneg %p1149_p0 }
 0x1da   : > { %p1156_p4 = por %p1155_p3, %p1154_p2 }
 0x1dc   : > { %p1157_p7 = pnand %p1156_p4, %p1150_p1 }
 0x1de   : > { %1160 = shalt.err (!%p1157_p7)
}
 0x1df   : > { %s1161_s30 = scalar_lea.hbm %s1393_s13, 512  ;;  %s1165_s11 = scalar_lea.hbm %s1468_s5, 2048 }
 0x1e0   : > { %p1162_p8 = scmp.ne.s32.totalorder %s1393_s13, %s1161_s30  ;;  %p1166_p11 = scmp.lt.s32.totalorder %s1393_s13, %s1468_s5 }
 0x1e1   : > { %p1167_p12 = scmp.lt.s32.totalorder %s1165_s11, %s1161_s30 }
 0x1e2   : > { %p1163_p9 = pnand %p1162_p8, %p1286_p5 }
 0x1e3   : > { %p1168_p13 = por %p1167_p12, %p1166_p11 }
 0x1e4   : > { %p1164_p10 = pneg %p1163_p9 }
 0x1e6   : > { %p1169_p0 = pnand %p1168_p13, %p1164_p10 }
 0x1e8   : > { %1172 = shalt.err (!%p1169_p0)
}
 0x1e9   : > { %1049 = dma.vmem_to_hbm [thread:$0]  (%p1286_p5), %s1387_s7, 512, %s1393_s13, %s729_s17, %s1215_s15, %s1215_s15, %s1216_s16  }
 0x1ea PF: > { %p1059_p1 = scmp.ge.s32.totalorder %s1211_s21, 2  ;;  %s773_s22 = sand.u32 1, %s1199_s18  }
 0x1eb   : > { %s774_s12 = scalar_lea.sflag [#allocation3], %s773_s22 }
 0x1ec   : > { %p1053_p2 = pnand %p1059_p1, %p1290_p6 }
 0x1ee   : > { %p1054_p3 = pneg %p1053_p2 }
 0x1f0   : > { %1190 = dma.done.wait (%p1054_p3), %s774_s12, 512  }
 0x1f1   : > { %1192 = vsyncadd (%p1054_p3), %s774_s12, 4294966784  ;;  %s783_s25 = scalar_lea.sflag [#allocation5], %s773_s22 }
 0x1f2   : > { %1194 = dma.done.wait (%p1054_p3), %s783_s25, 512  }
 0x1f3   : > { %1196 = vsyncadd (%p1054_p3), %s783_s25, 4294966784  ;;  %p19_p5 = scmp.ge.s32.totalorder %s1273_s24, 6   ;;  %s1471_s18 = smov %s1203_s19 }
 0x1f4   : > { %s1472_s19 = smov %s1207_s20  ;;  %s1473_s20 = smov %s1284_s27 }
 0x1f5   : > { %s1474_s21 = smov %s1273_s24  ;;  %21 = sbr.rel (!%p19_p5) target bundleno = 5 (0x5), region = 88 }
 0x1fa   :  { %788 = vsyncpa [#allocation3], 1 }
 0x1fb   :  { %790 = vsyncpa [#allocation3 + $0x1], 1 }
 0x1fc   :  { %791 = vsyncpa [#allocation5], 1 }
 0x1fd   :  { %793 = vsyncpa [#allocation5 + $0x1], 1 }

</bundles_post_ra>
